<compile_context>
chip_gen: v7x
topology: tpu7x:2x2x1
jax: 0.10.0
libtpu: 0.0.40
codegen_flags: <defaults>
</compile_context>

<pallas_src>
import functools

import jax
import jax.numpy as jnp
from jax.experimental import pallas as pl
from jax.experimental.pallas import tpu as pltpu

_LANE = 128          # lane width: pad num_classes to a multiple of this
_NEG_BIG = -1e30     # bias value for padded classes (-> zero softmax mass)
_VMEM_LIMIT = 32 * 1024 * 1024   # safe scoped-VMEM limit on v5e/v6e/v7x


def _round_up(x, m):
    return (x + m - 1) // m * m


def _linear_softmax_kernel(x_ref, w_ref, b_ref, out_ref):
    # logits = x @ W + b ; MXU with f32 accumulation (x/w may be bf16), f32 elementwise.
    logits = jnp.dot(x_ref[...], w_ref[...], preferred_element_type=jnp.float32)
    logits = logits + b_ref[...]                       # (TB, Cp) + (1, Cp)
    m = jnp.max(logits, axis=1, keepdims=True)
    e = jnp.exp(logits - m)
    denom = jnp.sum(e, axis=1, keepdims=True)
    out_ref[...] = (e * pl.reciprocal(denom, approx=True)).astype(out_ref.dtype)


def _linear_ce_kernel(x_ref, w_ref, b_ref, y_ref, loss_ref, acc_ref, *, tb, batch):
    # Cross-entropy with mean reduction, accumulated across batch tiles.
    i = pl.program_id(0)

    @pl.when(i == 0)
    def _():
        acc_ref[0] = jnp.float32(0.0)

    logits = jnp.dot(x_ref[...], w_ref[...], preferred_element_type=jnp.float32)
    logits = logits + b_ref[...]                                            # (TB, Cp)
    m = jnp.max(logits, axis=1, keepdims=True)
    lse = m + jnp.log(jnp.sum(jnp.exp(logits - m), axis=1, keepdims=True))  # (TB, 1)

    cls_ids = jax.lax.broadcasted_iota(jnp.int32, logits.shape, 1)          # (TB, Cp)
    onehot = cls_ids == y_ref[...]                                          # (TB,1) bcast
    picked = jnp.sum(jnp.where(onehot, logits, 0.0), axis=1, keepdims=True)  # (TB, 1)

    # Mask out padded batch rows (row index >= real batch size).
    row_ids = i * tb + jax.lax.broadcasted_iota(jnp.int32, (logits.shape[0], 1), 0)
    valid = row_ids < batch
    acc_ref[0] = acc_ref[0] + jnp.sum(jnp.where(valid, lse - picked, 0.0))

    @pl.when(i == pl.num_programs(0) - 1)
    def _():
        loss_ref[0, 0] = acc_ref[0] / jnp.float32(batch)


def torch_model_forward(x, w, b, y=None, *, tile_b=1024, use_bf16=True):
    """Mirrors TorchModel.forward: softmax(linear(x)) if y is None else CE loss.

    tile_b:   max batch-tile rows (multiple of 8). At tile_b=1024, D=32, Cp=128 the
              double-buffered VMEM footprint is ~2.3 MiB -> fits every generation
              (v7x's 64 MiB physical / 32 MiB scoped VMEM included).
    use_bf16: stream x/W as bf16 (f32 MXU accumulation) to halve HBM traffic.
    """
    B, D = x.shape
    C = w.shape[1]
    C_pad = _round_up(max(C, 1), _LANE)

    TB = min(tile_b, _round_up(B, 8))
    B_pad = _round_up(B, TB)
    n_tiles = B_pad // TB

    # Lane-dense class padding; padded bias columns get -1e30 so softmax/LSE ignore them.
    w_p = jnp.zeros((D, C_pad), w.dtype).at[:, :C].set(w)
    b_p = jnp.full((1, C_pad), _NEG_BIG, jnp.float32).at[0, :C].set(b.astype(jnp.float32))
    x_p = jnp.zeros((B_pad, D), x.dtype).at[:B, :].set(x)

    if use_bf16:
        x_p = x_p.astype(jnp.bfloat16)
        w_p = w_p.astype(jnp.bfloat16)

    x_spec = pl.BlockSpec((TB, D), lambda i: (i, 0))
    w_spec = pl.BlockSpec((D, C_pad), lambda i: (0, 0))     # VMEM-resident across tiles
    b_spec = pl.BlockSpec((1, C_pad), lambda i: (0, 0))     # VMEM-resident across tiles

    if y is None:
        out = pl.pallas_call(
            _linear_softmax_kernel,
            out_shape=jax.ShapeDtypeStruct((B_pad, C_pad), jnp.float32),
            grid_spec=pltpu.PrefetchScalarGridSpec(
                num_scalar_prefetch=0,
                grid=(n_tiles,),
                in_specs=[x_spec, w_spec, b_spec],
                out_specs=pl.BlockSpec((TB, C_pad), lambda i: (i, 0)),
            ),
            compiler_params=pltpu.CompilerParams(
                dimension_semantics=("parallel",),           # v7x: shard tiles over 2 TCs
                vmem_limit_bytes=_VMEM_LIMIT,
            ),
        )(x_p, w_p, b_p)
        return out[:B, :C]

    y_p = jnp.zeros((B_pad, 1), jnp.int32).at[:B, 0].set(y.astype(jnp.int32))
    y_spec = pl.BlockSpec((TB, 1), lambda i: (i, 0))
    kernel = functools.partial(_linear_ce_kernel, tb=TB, batch=B)
    loss = pl.pallas_call(
        kernel,
        out_shape=jax.ShapeDtypeStruct((1, 1), jnp.float32),
        grid_spec=pltpu.PrefetchScalarGridSpec(
            num_scalar_prefetch=0,
            grid=(n_tiles,),
            in_specs=[x_spec, w_spec, b_spec, y_spec],
            out_specs=pl.BlockSpec((1, 1), lambda i: (0, 0),
                                   memory_space=pltpu.MemorySpace.SMEM),
            scratch_shapes=[pltpu.SMEM((1,), jnp.float32)],
        ),
        compiler_params=pltpu.CompilerParams(
            dimension_semantics=("arbitrary",),              # cross-tile accumulator
            vmem_limit_bytes=_VMEM_LIMIT,
        ),
    )(x_p, w_p, b_p, y_p)
    return loss[0, 0]


def _reference(x, w, b, y=None, use_bf16=True):
    xf = x.astype(jnp.bfloat16).astype(jnp.float32) if use_bf16 else x
    wf = w.astype(jnp.bfloat16).astype(jnp.float32) if use_bf16 else w
    logits = xf @ wf + b
    if y is None:
        return jax.nn.softmax(logits, axis=1)
    lse = jax.nn.logsumexp(logits, axis=1)
    return jnp.mean(lse - logits[jnp.arange(x.shape[0]), y])


if __name__ == "__main__":
    D, C = 32, 16
    key = jax.random.PRNGKey(0)
    kx, kw, kb, ky = jax.random.split(key, 4)

    # Shapes from nn.Linear(input_size=32, num_classes=16); w is stored as W^T (in, out).
    w = jax.random.normal(kw, (D, C), dtype=jnp.float32) * 0.1
    b = jax.random.normal(kb, (C,), dtype=jnp.float32) * 0.1

    # --- Case 1: toy batch (single tile) ---
    B1 = 8
    x1 = jax.random.normal(kx, (B1, D), dtype=jnp.float32)
    y1 = jax.random.randint(ky, (B1,), 0, C, dtype=jnp.int32)

    probs1 = jax.block_until_ready(torch_model_forward(x1, w, b))
    loss1 = jax.block_until_ready(torch_model_forward(x1, w, b, y1))
    assert probs1.shape == (B1, C)
    assert jnp.allclose(probs1, _reference(x1, w, b), atol=5e-3), "softmax mismatch (B=8)"
    assert jnp.allclose(loss1, _reference(x1, w, b, y1), atol=2e-3), "loss mismatch (B=8)"

    # --- Case 2: multi-tile + padded-batch path (B=37 not a multiple of 8, TB=8 -> 5 tiles) ---
    B2 = 37
    x2 = jax.random.normal(kx, (B2, D), dtype=jnp.float32)
    y2 = jax.random.randint(ky, (B2,), 0, C, dtype=jnp.int32)

    probs2 = jax.block_until_ready(torch_model_forward(x2, w, b, tile_b=8))
    loss2 = jax.block_until_ready(torch_model_forward(x2, w, b, y2, tile_b=8))
    assert probs2.shape == (B2, C)
    assert jnp.allclose(probs2, _reference(x2, w, b), atol=5e-3), "softmax mismatch (B=37)"
    assert jnp.allclose(loss2, _reference(x2, w, b, y2), atol=2e-3), "loss mismatch (B=37)"

    print("KERNEL_OK")
</pallas_src>

<mosaic_0001>
module attributes {stable_mosaic.version = 11 : i64} {
  func.func @_linear_softmax_kernel(%arg0: i32, %arg1: memref<8x32xbf16, #tpu.memory_space<vmem>>, %arg2: memref<32x128xbf16, #tpu.memory_space<vmem>>, %arg3: memref<1x128xf32, #tpu.memory_space<vmem>>, %arg4: memref<8x128xf32, #tpu.memory_space<vmem>>) attributes {dimension_semantics = [#tpu.dimension_semantics<parallel>], iteration_bounds = array<i64: 1>, scalar_prefetch = 0 : i64, scratch_operands = 0 : i64, tpu.core_type = #tpu.core_type<tc>, window_params = [{transform_indices = @transform_0, window_bounds = array<i64: 8, 32>}, {pipeline_mode = #tpu.pipeline_mode<synchronous>, transform_indices = @transform_1, window_bounds = array<i64: 32, 128>}, {pipeline_mode = #tpu.pipeline_mode<synchronous>, transform_indices = @transform_2, window_bounds = array<i64: 1, 128>}, {transform_indices = @transform_3, window_bounds = array<i64: 8, 128>}]} {
    %c0 = arith.constant 0 : index
    %c0_0 = arith.constant 0 : index
    %0 = vector.load %arg1[%c0, %c0_0] : memref<8x32xbf16, #tpu.memory_space<vmem>>, vector<8x32xbf16>
    %c0_1 = arith.constant 0 : index
    %c0_2 = arith.constant 0 : index
    %1 = vector.load %arg2[%c0_1, %c0_2] : memref<32x128xbf16, #tpu.memory_space<vmem>>, vector<32x128xbf16>
    %cst = arith.constant dense<0.000000e+00> : vector<8x128xf32>
    %2 = tpu.matmul %0, %1, %cst {dimension_numbers = #tpu.dot_dimension_numbers<[1], [0], [0], [1], [0, 0, 1, 1], [], []>} : vector<8x32xbf16>, vector<32x128xbf16>, vector<8x128xf32> -> vector<8x128xf32>
    %c0_3 = arith.constant 0 : index
    %c0_4 = arith.constant 0 : index
    %3 = vector.load %arg3[%c0_3, %c0_4] : memref<1x128xf32, #tpu.memory_space<vmem>>, vector<1x128xf32>
    %4 = vector.broadcast %3 : vector<1x128xf32> to vector<8x128xf32>
    %5 = arith.addf %2, %4 : vector<8x128xf32>
    %cst_5 = arith.constant dense<0xFF800000> : vector<8xf32>
    %6 = vector.multi_reduction <maximumf>, %5, %cst_5 [1] : vector<8x128xf32> to vector<8xf32>
    %7 = vector.shape_cast %6 : vector<8xf32> to vector<8x1xf32>
    %8 = vector.broadcast %7 : vector<8x1xf32> to vector<8x128xf32>
    %9 = arith.subf %5, %8 : vector<8x128xf32>
    %10 = math.exp %9 : vector<8x128xf32>
    %cst_6 = arith.constant dense<0.000000e+00> : vector<8xf32>
    %11 = vector.multi_reduction <add>, %10, %cst_6 [1] : vector<8x128xf32> to vector<8xf32>
    %12 = vector.shape_cast %11 : vector<8xf32> to vector<8x1xf32>
    %13 = tpu.reciprocal %12 {approx = true} : vector<8x1xf32> -> vector<8x1xf32>
    %14 = vector.broadcast %13 : vector<8x1xf32> to vector<8x128xf32>
    %15 = arith.mulf %10, %14 : vector<8x128xf32>
    %c0_7 = arith.constant 0 : index
    %c0_8 = arith.constant 0 : index
    %16 = vector.load %arg4[%c0_7, %c0_8] : memref<8x128xf32, #tpu.memory_space<vmem>>, vector<8x128xf32>
    tpu.vector_store %arg4[%c0_7, %c0_8], %15 {strides = array<i32>} : memref<8x128xf32, #tpu.memory_space<vmem>>, vector<8x128xf32>,
    return
  }
  func.func @transform_0(%arg0: i32) -> (i32, i32) {
    %c0_i32 = arith.constant 0 : i32
    %c0_i32_0 = arith.constant 0 : i32
    return %arg0, %c0_i32 : i32, i32
  }
  func.func @transform_1(%arg0: i32) -> (i32, i32) {
    %c0_i32 = arith.constant 0 : i32
    %c0_i32_0 = arith.constant 0 : i32
    %c0_i32_1 = arith.constant 0 : i32
    return %c0_i32, %c0_i32_0 : i32, i32
  }
  func.func @transform_2(%arg0: i32) -> (i32, i32) {
    %c0_i32 = arith.constant 0 : i32
    %c0_i32_0 = arith.constant 0 : i32
    %c0_i32_1 = arith.constant 0 : i32
    return %c0_i32, %c0_i32_0 : i32, i32
  }
  func.func @transform_3(%arg0: i32) -> (i32, i32) {
    %c0_i32 = arith.constant 0 : i32
    %c0_i32_0 = arith.constant 0 : i32
    return %arg0, %c0_i32 : i32, i32
  }
}

</mosaic_0001>

<bundles_post_ra>
// kernel: tpu_custom_call.1
= control target key start
LH: loop header
LB: loop body
LE: loop exit
PB: predicated region body
PF: predicated region fallthrough
CT: control target
= control target key end

     0   :  { %8 = vsyncpa [#allocation3], 0  ;;  %s309_s0 = inlined_call_operand.hbm [shape: bf16[8,32], index: 0, kind: input, shape index: {}]   ;;  %s310_s1 = inlined_call_operand.hbm [shape: bf16[32,128], index: 1, kind: input, shape index: {}]   ;;  %s311_s2 = inlined_call_operand.vmem [shape: f32[1,128], index: 2, kind: input, shape index: {}]   ;;  %s312_s3 = inlined_call_operand.hbm [shape: f32[8,128], index: 3, kind: output, shape index: {}]  }
   0x1   :  { %9 = vsyncpa [#allocation6], 0 }
   0x2   :  { %10 = vsyncpa [#allocation4], 0  ;;  %s236_s12 = smov [#allocation2]   ;;  %s237_s14 = smov [#allocation5]  }
   0x3   :  { %s17_s13 = sshll.u32 %s236_s12, 4  ;;  %s26_s15 = sshll.u32 %s237_s14, 4  ;;  %s18_s13 = int_to_ptr.vmem [resolvable:$true] %s17_s13  ;;  %s263_s15 = int_to_ptr.vmem [resolvable:$true] %s26_s15 }
   0x4   :  { %s164_s18 = scalar_lea.hbm %s309_s0, 64 }
   0x5   :  { %p165_p0 = scmp.ne.s32.totalorder %s309_s0, %s164_s18  ;;  %p168_p1 = scmp.lt.u32.totalorder %s164_s18, %s309_s0 }
   0x7   :  { %p170_p2 = pnand %p168_p1, %p165_p0 }
   0x9   :  { %173 = shalt.err (!%p170_p2)
}
   0xa   :  { %s174_s23 = scalar_lea.vmem %s18_s13, 64  ;;  %p179_p4 = scmp.lt.s32.totalorder %s18_s13, %s18_s13 }
   0xb   :  { %p175_p3 = scmp.ne.s32.totalorder %s18_s13, %s174_s23  ;;  %p180_p5 = scmp.lt.s32.totalorder %s174_s23, %s174_s23 }
   0xd   :  { %p181_p6 = por %p180_p5, %p179_p4 }
   0xf   :  { %p182_p7 = pnand %p181_p6, %p175_p3 }
  0x11   :  { %185 = shalt.err (!%p182_p7)
}
  0x12   :  { %20 = dma.hbm_to_vmem [thread:$0]  %s309_s0, 64, %s18_s13, [#allocation3]  }
  0x13   :  { %s186_s28 = scalar_lea.hbm %s310_s1, 256 }
  0x14   :  { %p187_p8 = scmp.ne.s32.totalorder %s310_s1, %s186_s28  ;;  %p190_p9 = scmp.lt.u32.totalorder %s186_s28, %s310_s1 }
  0x16   :  { %p192_p10 = pnand %p190_p9, %p187_p8 }
  0x18   :  { %195 = shalt.err (!%p192_p10)
}
  0x19   :  { %s196_s6 = scalar_lea.vmem %s263_s15, 256  ;;  %p201_p12 = scmp.lt.s32.totalorder %s263_s15, %s263_s15 }
  0x1a   :  { %p197_p11 = scmp.ne.s32.totalorder %s263_s15, %s196_s6  ;;  %p202_p13 = scmp.lt.s32.totalorder %s196_s6, %s196_s6 }
  0x1c   :  { %p203_p0 = por %p202_p13, %p201_p12 }
  0x1e   :  { %p204_p1 = pnand %p203_p0, %p197_p11 }
  0x20   :  { %207 = shalt.err (!%p204_p1)
}
  0x21   :  { %s238_s0 = smov 64   ;;  %s239_s7 = smov 4  }
  0x22   :  { %32 = dma.hbm_to_vmem [thread:$0]  %s310_s1, 256, %s263_s15, [#allocation6], %s238_s0, %s238_s0, %s239_s7  }
  0x23   :  { %230 = dma.done.wait [#allocation3], 64  }
  0x24   :  { %231 = vsyncadd [#allocation3], 4294967232 }
  0x25   :  { %232 = dma.done.wait [#allocation6], 256  }
  0x26   :  { %233 = vsyncadd [#allocation6], 4294967040  ;;  %v240_v0 = vmov 0.0   ;;  %vm241_vm0 = vmmov 0   ;;  %v158_v1 = vld [vmem:[#allocation5] sm:$0xff]   ;;  %v159_v2 = vld [vmem:[#allocation5 + $0x8] sm:$0xff]  }
  0x27   :  { %143 = vmatprep.subr.bf16.mxu0 %v240_v0  ;;  %147 = vmatprep.mubr.msk.bf16.mxu0 %vm241_vm0, %v240_v0  ;;  %v42_v3 = vld [vmem:[#allocation2] sm:$0xf]  ;;  %vm66_vm1 = vcmask 261120   ;;  %s242_s1 = smov [#allocation7]  }
  0x28   :  { %144 = vmatpush3.bf16.msra.mxu0 %v158_v1  ;;  %v136_v4 = vld [vmem:[%s311_s2] ss:$0 sm:$0xff]  ;;  %s126_s12 = sshll.u32 %s242_s1, 4  ;;  %s127_s12 = int_to_ptr.vmem [resolvable:$true] %s126_s12 }
  0x29   :  { %145 = vmatprep.subr.bf16.mxu0 %v240_v0  ;;  %s208_s2 = scalar_lea.vmem %s127_s12, 128  ;;  %p213_p3 = scmp.lt.s32.totalorder %s127_s12, %s127_s12 }
  0x2a   :  { %p209_p2 = scmp.ne.s32.totalorder %s127_s12, %s208_s2  ;;  %p214_p4 = scmp.lt.s32.totalorder %s208_s2, %s208_s2 }
  0x2c   :  { %146 = vmatpush3.bf16.msra.mxu0 %v159_v2  ;;  %p215_p5 = por %p214_p4, %p213_p3 }
  0x2e   :  { %p216_p6 = pnand %p215_p5, %p209_p2 }
  0x2f   :  { %148 = vmatmul.mubr.msk.bf16.vlgmr.msra.gmra.mrb[0].mxu0 %vm66_vm1, %v42_v3 }
 0x102   :  { %v104_v5 = vpop.f32.mrb[0].mxu0 }
 0x103   :  { %v105_v6 = vadd.f32 %v136_v4, %v104_v5  ;;  %v149_v7 = vpop.f32.mrb[1].mxu0 }
 0x104   :  { %v107_v8 = vpop.f32.mrb[2].mxu0 }
 0x105   :  { %110 = vmax.xlane.f32.xlu0 %v105_v6  ;;  %v150_v9 = vpop.f32.mrb[3].mxu0 }
 0x192   :  { %v111_v10 = vpop.xlane.xlu0 %110 }
 0x193   :  { %v112_v11 = vsub.f32 %v105_v6, %v111_v10 }
 0x195   :  { %v113_v12 = vmul.f32 1.442695, %v112_v11 }
 0x197   :  { %160 = vpow2.f32 %v113_v12 }
 0x1a1   :  { %v161_v13 = vpop.eup %160 }
 0x1a2   :  { %115 = vadd.xlane.f32.xlu0 %v161_v13 }
 0x22f   :  { %v116_v14 = vpop.xlane.xlu0 %115 }
 0x230   :  { %162 = vrcp.f32 %v116_v14 }
 0x23a   :  { %v163_v15 = vpop.eup %162 }
 0x23b   :  { %v118_v16 = vmul.f32 %v163_v15, %v161_v13 }
 0x23d   :  { %119 = vst [vmem:[#allocation7] sm:$0xff] %v118_v16 }
 0x23e   :  { %219 = shalt.err (!%p216_p6)
}
 0x23f   :  { %s220_s15 = scalar_lea.hbm %s312_s3, 128 }
 0x240   :  { %p221_p7 = scmp.ne.s32.totalorder %s312_s3, %s220_s15  ;;  %p224_p8 = scmp.lt.u32.totalorder %s220_s15, %s312_s3 }
 0x242   :  { %p226_p9 = pnand %p224_p8, %p221_p7 }
 0x244   :  { %229 = shalt.err (!%p226_p9)
}
 0x245   :  { %129 = dma.vmem_to_hbm [thread:$0]  %s127_s12, 128, %s312_s3, [#allocation4]  }
 0x246   :  { %234 = dma.done.wait [#allocation4], 128  }
 0x247   :  { %235 = vsyncadd [#allocation4], 4294967168 }
 0x248   :  { %133 = vsyncpa [#allocation3], 1 }
 0x249   :  { %134 = vsyncpa [#allocation6], 1 }
 0x24a   :  { %135 = vsyncpa [#allocation4], 1 }

</bundles_post_ra>
